<compile_context>
chip_gen: v5e
topology: v5e:2x2
jax: 0.10.0
libtpu: 0.0.40
codegen_flags: <defaults>
</compile_context>

<pallas_src>
import math

import jax
import jax.numpy as jnp
from jax import lax
from jax.experimental import pallas as pl
from jax.experimental.pallas import tpu as pltpu


VMEM_LIMIT_BYTES = 48 * 1024 * 1024


# ----------------------------------------------------------------------------
# Pallas kernels
# ----------------------------------------------------------------------------
def _conv_stats_kernel(p_ref, w_ref, y_ref, stat_ref):
    """One (sample, M-tile) step of the conv matmul, M on the lane axis.

    p_ref    : (K, tm)    bf16 im2col columns for this tile (N dim squeezed)
    w_ref    : (Cout, K)  bf16 reshaped conv weights (resident across grid)
    y_ref    : (Cout, tm) f32 conv output tile (lane-dense stores)
    stat_ref : (Cout, 2)  f32 per-tile partial [sum, sum-of-squares]
    """
    y = jnp.dot(w_ref[...], p_ref[...], preferred_element_type=jnp.float32)
    s1 = jnp.sum(y, axis=-1, keepdims=True)
    s2 = jnp.sum(y * y, axis=-1, keepdims=True)
    stat_ref[...] = jnp.concatenate([s1, s2], axis=-1)
    y_ref[...] = y


def _bn_apply_kernel(y_ref, scale_ref, shift_ref, o_ref):
    """Elementwise BN apply on a (Cout, tm2) tile: o = y * scale + shift."""
    o_ref[...] = y_ref[...] * scale_ref[...] + shift_ref[...]


# ----------------------------------------------------------------------------
# Glue (im2col, tiling choice, stats finalization)
# ----------------------------------------------------------------------------
def _round_up(a, b):
    return (a + b - 1) // b * b


def _pick_tm(S, K, Cout, n_samples, *, target_bytes=2 << 20,
             vmem_budget=20 << 20, tm_min=512, tm_max=4096):
    """Kernel-1 M-tile: sized by bytes/step, capped by VMEM working set,
    >=2 total grid steps (v7x), prefers an exact divisor of S (no HBM pad)."""
    tm = _round_up(max(target_bytes // max(2 * K, 1), 128), 128)
    tm = max(tm_min, min(tm, tm_max))
    # double-buffered bf16 pT block + double-buffered f32 y block, per lane
    per_lane = 2 * K * 2 + 2 * Cout * 4
    tm = min(tm, max(128, (vmem_budget // per_lane) // 128 * 128))
    tm = min(tm, _round_up(S, 128))
    # keep >= 2 grid steps so both v7x TensorCores get work
    while n_samples * ((S + tm - 1) // tm) < 2 and tm > 128:
        tm = max(128, _round_up(tm // 2, 128))
    # prefer an exact divisor of S, but never trade more than 2x tile size
    best = None
    t = 128
    while t <= min(tm, S):
        if S % t == 0:
            best = t
        t += 128
    if best is not None and best * 2 >= tm:
        return best
    return tm


def _pick_tm2(Sp, Cout, n_samples, *, budget=12 << 20):
    """Kernel-2 lane tile: as large as the VMEM budget allows while dividing
    Sp exactly (Sp is a multiple of 128)."""
    per_lane = Cout * 4 * 2 * 2          # f32 in + f32 out, double-buffered
    max_lanes = max(128, (budget // per_lane) // 128 * 128)
    if n_samples < 2:                    # keep >= 2 grid steps for v7x
        max_lanes = min(max_lanes, max(128, (Sp // 2) // 128 * 128))
    best = 128
    t = 128
    while t <= min(Sp, max_lanes):
        if Sp % t == 0:
            best = t
        t += 128
    return best


def _im2col(x, k, stride, padding):
    """Per-sample im2col matrix (N, K, S) with K = Cin*k^3, S = Do*Ho*Wo.

    K ordering (cin, kd, kh, kw) matches weight.reshape(Cout, Cin*k^3); the
    final reshape only merges contiguous dims (no transpose / extra pass).
    """
    N, C, D, H, W = x.shape
    xp = jnp.pad(x, ((0, 0), (0, 0),
                     (padding, padding), (padding, padding), (padding, padding)))
    Do = (D + 2 * padding - k) // stride + 1
    Ho = (H + 2 * padding - k) // stride + 1
    Wo = (W + 2 * padding - k) // stride + 1
    cols = []
    for kd in range(k):
        for kh in range(k):
            for kw in range(k):
                cols.append(xp[:, :,
                               kd:kd + stride * Do:stride,
                               kh:kh + stride * Ho:stride,
                               kw:kw + stride * Wo:stride])
    patches = jnp.stack(cols, axis=2)                 # (N, C, k^3, Do, Ho, Wo)
    return patches.reshape(N, C * k ** 3, Do * Ho * Wo), (Do, Ho, Wo)


def cb_forward(x, weight, gamma, beta, *, stride=1, eps=1e-3):
    """Forward of CB: Conv3d(bias=False) + BatchNorm3d (training-mode stats)."""
    N, Cin, D, H, W = x.shape
    Cout, Cin_w, k, _, _ = weight.shape
    assert Cin == Cin_w
    padding = (k - 1) // 2

    # bf16 im2col in the native (N, K, S) layout -- no wrapper-side transpose.
    # TODO(synk): fuse im2col into kernel 1 (manual halo DMA of the raw padded
    # input, taps built in VMEM) to remove the ~k^3 x materialization.
    p, (Do, Ho, Wo) = _im2col(x.astype(jnp.bfloat16), k, stride, padding)
    _, K, S = p.shape
    w_mat = weight.reshape(Cout, K).astype(jnp.bfloat16)   # (Cout, K)

    tm = _pick_tm(S, K, Cout, N)
    Sp = _round_up(S, tm)
    if Sp != S:
        # Zero columns contribute 0 to both partial sums (stats stay exact).
        p = jnp.pad(p, ((0, 0), (0, 0), (0, Sp - S)))
    n_tiles = Sp // tm

    # --- kernel 1: conv matmul + per-tile partial BN statistics --------------
    y, stat = pl.pallas_call(
        _conv_stats_kernel,
        out_shape=(
            jax.ShapeDtypeStruct((N, Cout, Sp), jnp.float32),
            jax.ShapeDtypeStruct((N, n_tiles, Cout, 2), jnp.float32),
        ),
        grid_spec=pltpu.PrefetchScalarGridSpec(
            num_scalar_prefetch=0,
            grid=(N, n_tiles),
            in_specs=[
                pl.BlockSpec((None, K, tm), lambda n, i: (n, 0, i)),   # full K
                pl.BlockSpec((Cout, K), lambda n, i: (0, 0)),          # resident
            ],
            out_specs=(
                pl.BlockSpec((None, Cout, tm), lambda n, i: (n, 0, i)),
                pl.BlockSpec((None, None, Cout, 2), lambda n, i: (n, i, 0, 0)),
            ),
        ),
        compiler_params=pltpu.CompilerParams(
            dimension_semantics=("parallel", "parallel"),
            vmem_limit_bytes=VMEM_LIMIT_BYTES),
    )(p, w_mat)

    # --- finalize batch statistics (tiny per-channel math, plain JAX) --------
    m = jnp.float32(N * S)                                  # real count/channel
    y_sum = jnp.sum(stat[..., 0], axis=(0, 1)).reshape(Cout, 1)
    y_ssq = jnp.sum(stat[..., 1], axis=(0, 1)).reshape(Cout, 1)
    mean = y_sum / m
    var = jnp.maximum(y_ssq / m - mean * mean, 0.0)         # cancellation guard
    rstd = lax.rsqrt(var + eps)
    scale = gamma.reshape(Cout, 1).astype(jnp.float32) * rstd
    shift = beta.reshape(Cout, 1).astype(jnp.float32) - mean * scale

    # --- kernel 2: BN apply (large lane-dense tiles, final layout) -----------
    tm2 = _pick_tm2(Sp, Cout, N)
    out = pl.pallas_call(
        _bn_apply_kernel,
        out_shape=jax.ShapeDtypeStruct((N, Cout, Sp), jnp.float32),
        grid_spec=pltpu.PrefetchScalarGridSpec(
            num_scalar_prefetch=0,
            grid=(N, Sp // tm2),
            in_specs=[
                pl.BlockSpec((None, Cout, tm2), lambda n, i: (n, 0, i)),
                pl.BlockSpec((Cout, 1), lambda n, i: (0, 0)),
                pl.BlockSpec((Cout, 1), lambda n, i: (0, 0)),
            ],
            out_specs=pl.BlockSpec((None, Cout, tm2), lambda n, i: (n, 0, i)),
        ),
        compiler_params=pltpu.CompilerParams(
            dimension_semantics=("parallel", "parallel"),
            vmem_limit_bytes=VMEM_LIMIT_BYTES),
    )(y, scale, shift)

    if Sp != S:
        out = out[:, :, :S]
    return out.reshape(N, Cout, Do, Ho, Wo)


# ----------------------------------------------------------------------------
# Pure-JAX f32 reference (for correctness check)
# ----------------------------------------------------------------------------
def cb_reference(x, weight, gamma, beta, *, stride=1, eps=1e-3):
    k = weight.shape[2]
    padding = (k - 1) // 2
    y = lax.conv_general_dilated(
        x, weight,
        window_strides=(stride, stride, stride),
        padding=[(padding, padding)] * 3,
        dimension_numbers=("NCDHW", "OIDHW", "NCDHW"))
    mean = jnp.mean(y, axis=(0, 2, 3, 4), keepdims=True)
    var = jnp.mean((y - mean) ** 2, axis=(0, 2, 3, 4), keepdims=True)
    g = gamma.reshape(1, -1, 1, 1, 1)
    b = beta.reshape(1, -1, 1, 1, 1)
    return (y - mean) / jnp.sqrt(var + eps) * g + b


# ----------------------------------------------------------------------------
if __name__ == "__main__":
    # Small shapes consistent with CB(nIn=4, nOut=8, kSize=3, stride=1)
    N, Cin, Cout, D, H, W, k, stride = 2, 4, 8, 8, 8, 8, 3, 1

    key = jax.random.PRNGKey(0)
    kx, kw_, kg, kb = jax.random.split(key, 4)

    x = jax.random.normal(kx, (N, Cin, D, H, W), dtype=jnp.float32)
    fan_in = Cin * k * k * k
    weight = jax.random.normal(kw_, (Cout, Cin, k, k, k), dtype=jnp.float32) / math.sqrt(fan_in)
    gamma = 1.0 + 0.1 * jax.random.normal(kg, (Cout,), dtype=jnp.float32)
    beta = 0.1 * jax.random.normal(kb, (Cout,), dtype=jnp.float32)

    out = cb_forward(x, weight, gamma, beta, stride=stride, eps=1e-3)
    out = jax.block_until_ready(out)

    ref = cb_reference(x, weight, gamma, beta, stride=stride, eps=1e-3)
    assert out.shape == ref.shape == (N, Cout, D, H, W)
    max_err = float(jnp.max(jnp.abs(out - ref)))
    mean_err = float(jnp.mean(jnp.abs(out - ref)))
    # Tolerances account for bf16 storage of the im2col matrix and weights
    # (the pre-BN intermediate is now f32); activations are ~unit scale here.
    assert max_err < 8e-2, f"max abs error {max_err}"
    assert mean_err < 1e-2, f"mean abs error {mean_err}"

    print("KERNEL_OK")
</pallas_src>

<mosaic_0001>
module attributes {stable_mosaic.version = 11 : i64} {
  func.func @_conv_stats_kernel(%arg0: i32, %arg1: i32, %arg2: memref<1x108x512xbf16, #tpu.memory_space<vmem>>, %arg3: memref<8x108xbf16, #tpu.memory_space<vmem>>, %arg4: memref<1x8x512xf32, #tpu.memory_space<vmem>>, %arg5: memref<1x1x8x2xf32, #tpu.memory_space<vmem>>) attributes {dimension_semantics = [#tpu.dimension_semantics<parallel>, #tpu.dimension_semantics<parallel>], iteration_bounds = array<i64: 2, 1>, scalar_prefetch = 0 : i64, scratch_operands = 0 : i64, tpu.core_type = #tpu.core_type<tc>, window_params = [{transform_indices = @transform_0, window_bounds = array<i64: 1, 108, 512>}, {pipeline_mode = #tpu.pipeline_mode<synchronous>, transform_indices = @transform_1, window_bounds = array<i64: 8, 108>}, {transform_indices = @transform_2, window_bounds = array<i64: 1, 8, 512>}, {transform_indices = @transform_3, window_bounds = array<i64: 1, 1, 8, 2>}]} {
    %c0 = arith.constant 0 : index
    %c0_0 = arith.constant 0 : index
    %0 = vector.load %arg3[%c0, %c0_0] : memref<8x108xbf16, #tpu.memory_space<vmem>>, vector<8x108xbf16>
    %c0_1 = arith.constant 0 : index
    %c0_2 = arith.constant 0 : index
    %c0_3 = arith.constant 0 : index
    %1 = vector.load %arg2[%c0_1, %c0_2, %c0_3] : memref<1x108x512xbf16, #tpu.memory_space<vmem>>, vector<1x108x512xbf16>
    %2 = vector.shape_cast %1 : vector<1x108x512xbf16> to vector<108x512xbf16>
    %cst = arith.constant dense<0.000000e+00> : vector<8x512xf32>
    %3 = tpu.matmul %0, %2, %cst {dimension_numbers = #tpu.dot_dimension_numbers<[1], [0], [0], [1], [0, 0, 1, 1], [], []>} : vector<8x108xbf16>, vector<108x512xbf16>, vector<8x512xf32> -> vector<8x512xf32>
    %cst_4 = arith.constant dense<0.000000e+00> : vector<8xf32>
    %4 = vector.multi_reduction <add>, %3, %cst_4 [1] : vector<8x512xf32> to vector<8xf32>
    %5 = vector.shape_cast %4 : vector<8xf32> to vector<8x1xf32>
    %6 = arith.mulf %3, %3 : vector<8x512xf32>
    %cst_5 = arith.constant dense<0.000000e+00> : vector<8xf32>
    %7 = vector.multi_reduction <add>, %6, %cst_5 [1] : vector<8x512xf32> to vector<8xf32>
    %8 = vector.shape_cast %7 : vector<8xf32> to vector<8x1xf32>
    %9 = tpu.concatenate %5, %8 in 1 : vector<8x1xf32>, vector<8x1xf32> -> vector<8x2xf32>
    %c0_6 = arith.constant 0 : index
    %c0_7 = arith.constant 0 : index
    %c0_8 = arith.constant 0 : index
    %c0_9 = arith.constant 0 : index
    %10 = vector.load %arg5[%c0_6, %c0_7, %c0_8, %c0_9] : memref<1x1x8x2xf32, #tpu.memory_space<vmem>>, vector<1x1x8x2xf32>
    %11 = vector.shape_cast %10 : vector<1x1x8x2xf32> to vector<8x2xf32>
    %12 = vector.shape_cast %9 : vector<8x2xf32> to vector<1x1x8x2xf32>
    tpu.vector_store %arg5[%c0_6, %c0_7, %c0_8, %c0_9], %12 {strides = array<i32>} : memref<1x1x8x2xf32, #tpu.memory_space<vmem>>, vector<1x1x8x2xf32>,
    %c0_10 = arith.constant 0 : index
    %c0_11 = arith.constant 0 : index
    %c0_12 = arith.constant 0 : index
    %13 = vector.load %arg4[%c0_10, %c0_11, %c0_12] : memref<1x8x512xf32, #tpu.memory_space<vmem>>, vector<1x8x512xf32>
    %14 = vector.shape_cast %13 : vector<1x8x512xf32> to vector<8x512xf32>
    %15 = vector.shape_cast %3 : vector<8x512xf32> to vector<1x8x512xf32>
    tpu.vector_store %arg4[%c0_10, %c0_11, %c0_12], %15 {strides = array<i32>} : memref<1x8x512xf32, #tpu.memory_space<vmem>>, vector<1x8x512xf32>,
    return
  }
  func.func @transform_0(%arg0: i32, %arg1: i32) -> (i32, i32, i32) {
    %c0_i32 = arith.constant 0 : i32
    %c0_i32_0 = arith.constant 0 : i32
    return %arg0, %c0_i32, %arg1 : i32, i32, i32
  }
  func.func @transform_1(%arg0: i32, %arg1: i32) -> (i32, i32) {
    %c0_i32 = arith.constant 0 : i32
    %c0_i32_0 = arith.constant 0 : i32
    %c0_i32_1 = arith.constant 0 : i32
    return %c0_i32, %c0_i32_0 : i32, i32
  }
  func.func @transform_2(%arg0: i32, %arg1: i32) -> (i32, i32, i32) {
    %c0_i32 = arith.constant 0 : i32
    %c0_i32_0 = arith.constant 0 : i32
    return %arg0, %c0_i32, %arg1 : i32, i32, i32
  }
  func.func @transform_3(%arg0: i32, %arg1: i32) -> (i32, i32, i32, i32) {
    %c0_i32 = arith.constant 0 : i32
    %c0_i32_0 = arith.constant 0 : i32
    %c0_i32_1 = arith.constant 0 : i32
    return %arg0, %arg1, %c0_i32, %c0_i32_0 : i32, i32, i32, i32
  }
}

</mosaic_0001>

<bundles_post_ra>
// kernel: tpu_custom_call.1
= control target key start
LH: loop header
LB: loop body
LE: loop exit
PB: predicated region body
PF: predicated region fallthrough
CT: control target
= control target key end

     0   :  { %9 = vsyncpa [#allocation3], 0  ;;  %s1095_s0 = inlined_call_operand.vmem [shape: bf16[2,108,512], index: 0, kind: input, shape index: {}]   ;;  %s1096_s1 = inlined_call_operand.vmem [shape: bf16[8,108], index: 1, kind: input, shape index: {}]   ;;  %s1097_s2 = inlined_call_operand.hbm [shape: f32[2,8,512], index: 2, kind: output, shape index: {0}]   ;;  %s1098_s3 = inlined_call_operand.vmem [shape: f32[2,1,8,2], index: 3, kind: output, shape index: {1}]  }
   0x1   :  { %11 = vsyncpa [#allocation3 + $0x1], 0  ;;  %s926_s12 = smov 0   ;;  %s928_s13 = smov 0  }
   0x2   :  { %s930_s14 = smov 0   ;;  %s932_s15 = smov 0  }
   0x3   :  { %s934_s16 = smov 0   ;;  %s936_s17 = smov 0  }
   0x4 LB: > { %s612_s18 = sadd.s32 4294967295, %s904_s17   ;;  %s613_s19 = sadd.s32 4294967294, %s904_s17   ;;  %s904_s17 = sphi %s936_s17, %s17_s17   ;;  %s900_s16 = sphi %s934_s16, %s1105_s16   ;;  %s896_s15 = sphi %s932_s15, %s1104_s15   ;;  %s892_s14 = sphi %s930_s14, %s1103_s14   ;;  %s888_s13 = sphi %s928_s13, %s1102_s13   ;;  %s884_s12 = sphi %s926_s12, %s1101_s12  }
   0x5   : > { %s29_s20 = sadd.s32 1, %s900_s16  ;;  %s87_s21 = sadd.s32 1, %s892_s14 }
   0x6   : > { %p31_p0 = scmp.ge.s32.totalorder %s29_s20, 2  ;;  %p97_p1 = scmp.ne.s32.totalorder %s892_s14, %s888_s13 }
   0x7   : > { %p98_p2 = scmp.eq.s32.totalorder %s612_s18, 1  ;;  %p103_p3 = scmp.ne.s32.totalorder %s888_s13, %s884_s12 }
   0x8   : > { %s1107_s20 = smov (%p31_p0, %s29_s20), 0  ;;  %p104_p5 = scmp.eq.s32.totalorder %s613_s19, 1 }
   0x9   : > { %p966_p4 = por %p98_p2, %p97_p1  ;;  %s82_s23 = ssub.s32 %s900_s16, %s1107_s20 }
   0xa   : > { %p616_p6 = scmp.ge.s32.totalorder %s904_s17, 1  ;;  %p85_p7 = scmp.eq.s32.totalorder %s82_s23, 0 }
   0xb   : > { %p973_p8 = por %p104_p5, %p103_p3  ;;  %p166_p9 = scmp.lt.s32.totalorder %s904_s17, 3 }
   0xc   : > { %s979_s25 = scalar_select %p85_p7, %s892_s14, %s87_s21  }
   0xd   : > { %p167_p10 = pnand %p616_p6, %p166_p9 }
   0xe   : > { %p202_p11 = scmp.lt.s32.totalorder (!%p167_p10), %s896_s15, 1  ;;  %s189_s6 = sand.u32 (!%p167_p10), 1, %s888_s13  }
   0xf   : > { %170 = sbr.rel (%p167_p10) target bundleno = 319 (0x13f), region = 28  ;;  %s617_s7 = sshll.u32 (!%p167_p10), %s189_s6, 5 }
  0x10   : > { %s191_s8 = scalar_lea.vmem (!%p167_p10), [#allocation2], %s617_s7  ;;  %s769_s9 = sshll.u32 (!%p167_p10), %s896_s15, 5 }
  0x11   : > { %s497_s18 = scalar_lea.hbm (!%p167_p10), %s1097_s2, %s769_s9  ;;  %s499_s19 = sshll.u32 (!%p167_p10), %s191_s8, 4  ;;  %s500_s19 = int_to_ptr.vmem [resolvable:$true] %s499_s19 }
  0x12   : > { %s501_s21 = sshll.u32 (!%p167_p10), %s497_s18, 4  ;;  %s502_s21 = int_to_ptr.hbm [resolvable:$true] %s501_s21 }
  0x13   : > { %s840_s23 = sshra.s32 (!%p167_p10), %s502_s21, 4  ;;  %s841_s23 = int_to_ptr.hbm [resolvable:$true] %s840_s23 }
  0x14   : > { %s983_s26 = scalar_select %p202_p11, %s896_s15, 1  ;;  %vm389_vm0 = vcmask 1045504   ;;  %vm385_vm1 = vcmask 883712  }
  0x15   : > { %s477_s15 = scalar_lea.sflag [#allocation3], %s189_s6  ;;  %p847_p1 = scmp.lt.s32.totalorder %s841_s23, %s1097_s2 }
  0x16   : > { %s770_s27 = smul.u32 224, %s983_s26 }
  0x18   : > { %s989_s30 = scalar_lea.vmem %s1095_s0, %s770_s27  ;;  %s842_s27 = scalar_lea.hbm %s841_s23, 32 }
  0x19   : > { %v718_v0 = vld [vmem:[%s989_s30 + $0xc0] sm:$0xf]  ;;  %v767_v1 = vld [vmem:[%s989_s30 + $0xcc] sm:$0x30]  ;;  %v765_v2 = vld [vmem:[%s989_s30 + $0xc4] sm:$0xf]  ;;  %p843_p12 = scmp.ne.s32.totalorder %s841_s23, %s842_s27 }
  0x1a   : > { %v719_v3 = vor.u32 %v767_v1, %v718_v0  ;;  %v720_v4 = vld [vmem:[%s989_s30 + $0xd0] sm:$0x30]  ;;  %v726_v5 = vld [vmem:[%s989_s30 + $0xc8] sm:$0xf]  ;;  %v768_v6 = vld [vmem:[%s989_s30 + $0xd4] sm:$0x30] }
  0x1b   : > { %v723_v7 = vor.u32 %v765_v2, %v720_v4  ;;  %v727_v8 = vor.u32 %v768_v6, %v726_v5  ;;  %v766_v9 = vld [vmem:[%s989_s30 + $0xcc] sm:$0xf]  ;;  %v728_v10 = vld [vmem:[%s989_s30 + $0xd8] sm:$0x30]  ;;  %v702_v11 = vld [vmem:[%s989_s30 + $0xa0] sm:$0xf]  ;;  %p844_p13 = pnand %p843_p12, %p966_p4 }
  0x1c   : > { %v391_v12 = vsel %vm389_vm0, %v719_v3, 0  ;;  %v731_v13 = vor.u32 %v766_v9, %v728_v10  ;;  %v763_v14 = vld [vmem:[%s989_s30 + $0xac] sm:$0xf0]  ;;  %v761_v15 = vld [vmem:[%s989_s30 + $0xa4] sm:$0xf] }
  0x1d   : > { %403 = vmatpush.bf16.msra.mxu0 %v391_v12  ;;  %v394_v16 = vsel %vm389_vm0, %v723_v7, 0  ;;  %v397_v17 = vsel %vm389_vm0, %v727_v8, 0  ;;  %v703_v18 = vor.u32 %v763_v14, %v702_v11  ;;  %v704_v19 = vld [vmem:[%s989_s30 + $0xb0] sm:$0xf0]  ;;  %v710_v20 = vld [vmem:[%s989_s30 + $0xa8] sm:$0xf]  ;;  %p845_p0 = pneg %p844_p13 }
  0x1e   : > { %416 = vmatpush.bf16.msra.mxu1 %v394_v16  ;;  %429 = vmatpush.bf16.msra.mxu2 %v397_v17  ;;  %v400_v21 = vsel %vm389_vm0, %v731_v13, 0  ;;  %v707_v22 = vor.u32 %v761_v15, %v704_v19  ;;  %v764_v23 = vld [vmem:[%s989_s30 + $0xb4] sm:$0xf0]  ;;  %v762_v24 = vld [vmem:[%s989_s30 + $0xac] sm:$0xf] }
  0x1f   : > { %442 = vmatpush.bf16.msra.mxu3 %v400_v21  ;;  %v711_v25 = vor.u32 %v764_v23, %v710_v20  ;;  %v712_v26 = vld [vmem:[%s989_s30 + $0xb8] sm:$0xf0]  ;;  %v686_v27 = vld [vmem:[%s989_s30 + $0x80] sm:$0xf]  ;;  %v759_v28 = vld [vmem:[%s989_s30 + $0x8c] sm:$0xf0] }
  0x20   : > { %v715_v29 = vor.u32 %v762_v24, %v712_v26  ;;  %v757_v30 = vld [vmem:[%s989_s30 + $0x84] sm:$0xf]  ;;  %v688_v31 = vld [vmem:[%s989_s30 + $0x90] sm:$0xf0]  ;;  %v694_v32 = vld [vmem:[%s989_s30 + $0x88] sm:$0xf]  ;;  %v687_v33 = vor.u32 %v759_v28, %v686_v27 }
  0x21   : > { %404 = vmatpush.bf16.msra.mxu0 %v703_v18  ;;  %v760_v34 = vld [vmem:[%s989_s30 + $0x94] sm:$0xf0]  ;;  %v758_v35 = vld [vmem:[%s989_s30 + $0x8c] sm:$0xf]  ;;  %v696_v36 = vld [vmem:[%s989_s30 + $0x98] sm:$0xf0]  ;;  %v691_v37 = vor.u32 %v757_v30, %v688_v31 }
  0x22   : > { %417 = vmatpush.bf16.msra.mxu1 %v707_v22  ;;  %430 = vmatpush.bf16.msra.mxu2 %v711_v25  ;;  %v695_v38 = vor.u32 %v760_v34, %v694_v32  ;;  %v670_v39 = vld [vmem:[%s989_s30 + $0x60] sm:$0xf]  ;;  %v755_v40 = vld [vmem:[%s989_s30 + $0x6c] sm:$0xf0]  ;;  %v753_v41 = vld [vmem:[%s989_s30 + $0x64] sm:$0xf]  ;;  %v699_v42 = vor.u32 %v758_v35, %v696_v36 }
  0x23   : > { %443 = vmatpush.bf16.msra.mxu3 %v715_v29  ;;  %v672_v43 = vld [vmem:[%s989_s30 + $0x70] sm:$0xf0]  ;;  %v678_v44 = vld [vmem:[%s989_s30 + $0x68] sm:$0xf]  ;;  %v756_v45 = vld [vmem:[%s989_s30 + $0x74] sm:$0xf0]  ;;  %v671_v48 = vor.u32 %v755_v40, %v670_v39 }
  0x24   : > { %v754_v46 = vld [vmem:[%s989_s30 + $0x6c] sm:$0xf]  ;;  %v680_v47 = vld [vmem:[%s989_s30 + $0x78] sm:$0xf0]  ;;  %v675_v49 = vor.u32 %v753_v41, %v672_v43  ;;  %v679_v50 = vor.u32 %v756_v45, %v678_v44  ;;  %v654_v51 = vld [vmem:[%s989_s30 + $0x40] sm:$0xf] }
  0x25   : > { %405 = vmatpush.bf16.msra.mxu0 %v687_v33  ;;  %v751_v52 = vld [vmem:[%s989_s30 + $0x4c] sm:$0xf0]  ;;  %v749_v53 = vld [vmem:[%s989_s30 + $0x44] sm:$0xf]  ;;  %v683_v54 = vor.u32 %v754_v46, %v680_v47  ;;  %v656_v55 = vld [vmem:[%s989_s30 + $0x50] sm:$0xf0] }
  0x26   : > { %418 = vmatpush.bf16.msra.mxu1 %v691_v37  ;;  %431 = vmatpush.bf16.msra.mxu2 %v695_v38  ;;  %v662_v56 = vld [vmem:[%s989_s30 + $0x48] sm:$0xf]  ;;  %v752_v57 = vld [vmem:[%s989_s30 + $0x54] sm:$0xf0]  ;;  %v750_v58 = vld [vmem:[%s989_s30 + $0x4c] sm:$0xf]  ;;  %v655_v60 = vor.u32 %v751_v52, %v654_v51  ;;  %v659_v61 = vor.u32 %v749_v53, %v656_v55 }
  0x27   : > { %444 = vmatpush.bf16.msra.mxu3 %v699_v42  ;;  %v664_v59 = vld [vmem:[%s989_s30 + $0x58] sm:$0xf0]  ;;  %v663_v62 = vor.u32 %v752_v57, %v662_v56  ;;  %v638_v63 = vld [vmem:[%s989_s30 + $0x20] sm:$0xf]  ;;  %v747_v0 = vld [vmem:[%s989_s30 + $0x2c] sm:$0xf0] }
  0x28   : > { %v745_v1 = vld [vmem:[%s989_s30 + $0x24] sm:$0xf]  ;;  %v667_v2 = vor.u32 %v750_v58, %v664_v59  ;;  %v640_v3 = vld [vmem:[%s989_s30 + $0x30] sm:$0xf0]  ;;  %v646_v4 = vld [vmem:[%s989_s30 + $0x28] sm:$0xf]  ;;  %v639_v8 = vor.u32 %v747_v0, %v638_v63 }
  0x29   : > { %406 = vmatpush.bf16.msra.mxu0 %v671_v48  ;;  %v748_v5 = vld [vmem:[%s989_s30 + $0x34] sm:$0xf0]  ;;  %v746_v6 = vld [vmem:[%s989_s30 + $0x2c] sm:$0xf]  ;;  %v648_v7 = vld [vmem:[%s989_s30 + $0x38] sm:$0xf0]  ;;  %v643_v9 = vor.u32 %v745_v1, %v640_v3 }
  0x2a   : > { %419 = vmatpush.bf16.msra.mxu1 %v675_v49  ;;  %432 = vmatpush.bf16.msra.mxu2 %v679_v50  ;;  %v647_v10 = vor.u32 %v748_v5, %v646_v4  ;;  %v622_v11 = vld [vmem:[%s989_s30] sm:$0xf]  ;;  %v743_v12 = vld [vmem:[%s989_s30 + $0xc] sm:$0xf0]  ;;  %v741_v13 = vld [vmem:[%s989_s30 + $0x4] sm:$0xf]  ;;  %v651_v14 = vor.u32 %v746_v6, %v648_v7 }
  0x2b   : > { %445 = vmatpush.bf16.msra.mxu3 %v683_v54  ;;  %v624_v15 = vld [vmem:[%s989_s30 + $0x10] sm:$0xf0]  ;;  %v630_v16 = vld [vmem:[%s989_s30 + $0x8] sm:$0xf]  ;;  %v744_v17 = vld [vmem:[%s989_s30 + $0x14] sm:$0xf0]  ;;  %v623_v20 = vor.u32 %v743_v12, %v622_v11 }
  0x2c   : > { %v742_v18 = vld [vmem:[%s989_s30 + $0xc] sm:$0xf]  ;;  %v632_v19 = vld [vmem:[%s989_s30 + $0x18] sm:$0xf0]  ;;  %v627_v21 = vor.u32 %v741_v13, %v624_v15  ;;  %v631_v22 = vor.u32 %v744_v17, %v630_v16  ;;  %v220_v24 = vld [vmem:[%s1096_s1] sm:$0xf] }
  0x2d   : > { %407 = vmatpush.bf16.msra.mxu0 %v655_v60  ;;  %v635_v23 = vor.u32 %v742_v18, %v632_v19  ;;  %s846_s30 = scalar_lea.hbm %s1097_s2, 64 }
  0x2e   : > { %420 = vmatpush.bf16.msra.mxu1 %v659_v61  ;;  %433 = vmatpush.bf16.msra.mxu2 %v663_v62  ;;  %p848_p2 = scmp.lt.s32.totalorder %s846_s30, %s842_s27 }
  0x2f   : > { %446 = vmatpush.bf16.msra.mxu3 %v667_v2 }
  0x30   : > { %p849_p3 = por %p848_p2, %p847_p1 }
  0x31   : > { %408 = vmatpush.bf16.msra.mxu0 %v639_v8 }
  0x32   : > { %421 = vmatpush.bf16.msra.mxu1 %v643_v9  ;;  %434 = vmatpush.bf16.msra.mxu2 %v647_v10  ;;  %p850_p5 = pnand %p849_p3, %p845_p0 }
  0x33   : > { %447 = vmatpush.bf16.msra.mxu3 %v651_v14 }
  0x35   : > { %409 = vmatpush.bf16.msra.mxu0 %v623_v20 }
  0x36   : > { %422 = vmatpush.bf16.msra.mxu1 %v627_v21  ;;  %435 = vmatpush.bf16.msra.mxu2 %v631_v22 }
  0x37   : > { %448 = vmatpush.bf16.msra.mxu3 %v635_v23 }
  0x38   : > { %732 = vmatmul.msk.bf16.vlgmr.msra.gmra.mxu0 %vm385_vm1, %v220_v24 }
  0x39   : > { %733 = vmatmul.msk.bf16.vlgmr.msra.gmra.mxu1 %vm385_vm1, %v220_v24  ;;  %734 = vmatmul.msk.bf16.vlgmr.msra.gmra.mxu2 %vm385_vm1, %v220_v24 }
  0x3a   : > { %735 = vmatmul.msk.bf16.vlgmr.msra.gmra.mxu3 %vm385_vm1, %v220_v24 }
  0xb5   : > { %v411_v25 = vpop.f32.mrf.mxu0 }
  0xb6   : > { %472 = vst [vmem:[%s191_s8] sm:$0xff] %v411_v25  ;;  %v424_v26 = vpop.f32.mrf.mxu1  ;;  %v459_v28 = vmul.f32 %v411_v25, %v411_v25 }
  0xb7   : > { %473 = vst [vmem:[%s191_s8 + $0x8] sm:$0xff] %v424_v26  ;;  %v454_v27 = vadd.f32 %v424_v26, %v411_v25  ;;  %v460_v29 = vmul.f32 %v424_v26, %v424_v26 }
  0xb9   : > { %v463_v37 = vadd.f32 %v460_v29, %v459_v28 }
  0xbc   : > { %v437_v30 = vpop.f32.mrf.mxu2 }
  0xbd   : > { %474 = vst [vmem:[%s191_s8 + $0x10] sm:$0xff] %v437_v30  ;;  %v450_v31 = vpop.f32.mrf.mxu3  ;;  %v413_v32 = vpop.f32.mrf.mxu0  ;;  %v455_v33 = vadd.f32 %v454_v27, %v437_v30  ;;  %v461_v35 = vmul.f32 %v437_v30, %v437_v30 }
  0xbe   : > { %475 = vst [vmem:[%s191_s8 + $0x18] sm:$0xff] %v450_v31  ;;  %v426_v34 = vpop.f32.mrf.mxu1 }
  0xbf   : > { %v456_v36 = vadd.f32 %v455_v33, %v450_v31 }
  0xc0   : > { %853 = shalt.err (!%p850_p5)
}
  0xc1   : > { %771 = dma.vmem_to_hbm [thread:$0]  (%p966_p4), %s500_s19, 512, %s502_s21, %s477_s15   ;;  %457 = vadd.xlane.f32.xlu0 %v456_v36  ;;  %v462_v38 = vmul.f32 %v450_v31, %v450_v31  ;;  %v464_v39 = vadd.f32 %v463_v37, %v461_v35  ;;  %vm468_vm2 = vcmask 7168   ;;  %vm470_vm3 = vcmask 15360  }
  0xc2   : > { %s619_s6 = sshll.u32 %s983_s26, 3 }
  0xc3   : > { %v465_v42 = vadd.f32 %v464_v39, %v462_v38  ;;  %s218_s9 = scalar_lea.vmem %s1098_s3, %s619_s6 }
  0xc4   : > { %v439_v40 = vpop.f32.mrf.mxu2 }
  0xc5   : > { %v452_v41 = vpop.f32.mrf.mxu3 }
  0xc9   : > { %466 = vadd.xlane.f32.xlu0 %v465_v42 }
 0x134   : > { %v458_v43 = vpop.xlane.xlu0 %457 }
 0x13c   : > { %v467_v44 = vpop.xlane.xlu0 %466 }
 0x13d   : > { %v469_v45 = vsel %vm468_vm2, %v458_v43, %v467_v44 }
 0x13e   : > { %471 = vst.msk [vmem:[%s218_s9] sm:$0xff] %vm470_vm3, %v469_v45 }
 0x13f PF: > { %p777_p4 = scmp.ge.s32.totalorder %s904_s17, 2  ;;  %s516_s22 = sand.u32 1, %s884_s12  }
 0x140   : > { %s517_s10 = scalar_lea.sflag [#allocation3], %s516_s22 }
 0x141   : > { %p774_p6 = pnand %p777_p4, %p973_p8 }
 0x143   : > { %p775_p7 = pneg %p774_p6 }
 0x145   : > { %879 = dma.done.wait (%p775_p7), %s517_s10, 512  }
 0x146   : > { %881 = vsyncadd (%p775_p7), %s517_s10, 4294966784  ;;  %s17_s17 = sadd.s32 1, %s904_s17   ;;  %s1101_s12 = smov %s888_s13 }
 0x147   : > { %p14_p9 = scmp.ge.s32.totalorder %s17_s17, 4   ;;  %s1102_s13 = smov %s892_s14 }
 0x148   : > { %s1103_s14 = smov %s979_s25  ;;  %s1104_s15 = smov %s900_s16 }
 0x149   : > { %s1105_s16 = smov %s1107_s20  ;;  %16 = sbr.rel (!%p14_p9) target bundleno = 4 (0x4), region = 75 }
 0x14e   :  { %533 = vsyncpa [#allocation3], 1 }
 0x14f   :  { %535 = vsyncpa [#allocation3 + $0x1], 1 }

</bundles_post_ra>
